<compile_context>
chip_gen: v7x
topology: tpu7x:2x2x1
jax: 0.10.0
libtpu: 0.0.40
codegen_flags: <defaults>
</compile_context>

<pallas_src>
import jax
import jax.numpy as jnp
from jax.experimental import pallas as pl
from jax.experimental.pallas import tpu as pltpu

BN_EPS = 1e-5
LANE = 128


def _round_up(v, m):
    return (v + m - 1) // m * m


def _pad2(a, rows, cols):
    return jnp.pad(a, ((0, rows - a.shape[0]), (0, cols - a.shape[1])))


def _vmem_limit_bytes():
    """Scoped-VMEM cap that respects the chip's physical VMEM (64 MiB on v7x,
    128 MiB on v5e/v6e), leaving headroom for surrounding XLA ops."""
    try:
        phys = int(getattr(pltpu.get_tpu_info(), "vmem_capacity_bytes", 64 << 20))
    except Exception:  # query unavailable (e.g. interpret mode)
        phys = 64 << 20
    return int(max(32 << 20, min(100 << 20, phys - (16 << 20))))


# --------------------------------------------------------------------------
# Kernels
# --------------------------------------------------------------------------
def _embed_kernel(emb_ref, x_ref, w_e_ref, w_x_ref, b_ref, h_ref):
    """h0 = relu(node_emb @ W_e + x @ W_xfused + b), emitted in bf16 only."""
    f32 = jnp.float32
    h = (
        jnp.dot(emb_ref[...], w_e_ref[...], preferred_element_type=f32)
        + jnp.dot(x_ref[...], w_x_ref[...], preferred_element_type=f32)
        + b_ref[...]
    )
    h_ref[...] = jnp.maximum(h, 0.0).astype(jnp.bfloat16)  # ReLU; dropout(eval)->id


def _sage_fused_kernel(a_ref, h0k_ref, h0row_ref, invdeg_ref, w_l_ref, b_l_ref,
                       w_r_ref, scale_ref, shift_ref, w_lin_ref, b_lin_ref,
                       out_ref, acc_ref):
    """K-tiled mean aggregation + SAGEConv + folded BN + ReLU + residual + head.

    grid = (row_tiles, k_tiles).  acc_ref holds f32 partial sums of
    A_tile @ h0; on the last K step the exact 1/deg post-scale and the whole
    epilogue run, writing a lane-dense [TM, 128] slab (column 0 = real logit).
    """
    f32 = jnp.float32
    k = pl.program_id(1)

    @pl.when(k == 0)
    def _():
        acc_ref[...] = jnp.zeros_like(acc_ref)

    # unnormalized 0/1-count adjacency (bf16) x bf16 h0, f32 MXU accumulate
    acc_ref[...] += jnp.dot(a_ref[...], h0k_ref[...], preferred_element_type=f32)

    @pl.when(k == pl.num_programs(1) - 1)
    def _():
        aggr = acc_ref[...] * invdeg_ref[...]            # exact f32 mean scale
        h0 = h0row_ref[...].astype(f32)
        z = (
            jnp.dot(aggr, w_l_ref[...], preferred_element_type=f32)
            + b_l_ref[...]
            + jnp.dot(h0, w_r_ref[...], preferred_element_type=f32)
        )
        z = z * scale_ref[...] + shift_ref[...]          # eval-mode BN (folded)
        h_new = jnp.maximum(z, 0.0)                      # ReLU; dropout(eval)->id
        h = h_new + h0                                   # residual
        out = jnp.dot(h, w_lin_ref[...], preferred_element_type=f32) + b_lin_ref[...]
        out_ref[...] = jnp.clip(out, -10.0, 10.0)


# --------------------------------------------------------------------------
# Wrapper
# --------------------------------------------------------------------------
def graphsage_forward(x, edge_index, params, num_layers):
    assert num_layers >= 1, "reference module requires num_layers >= 1"
    n, d = x.shape
    emb = params["node_emb"]                       # [N, E]
    e_dim = emb.shape[1]
    h_dim = params["w_cmb_e"].shape[1]
    f32 = jnp.float32

    # ---- padded / tiled sizes ------------------------------------------------
    hp = _round_up(h_dim, LANE)
    ep = _round_up(e_dim, LANE)
    TM_TARGET, TK_TARGET = 256, 512                # TM | TK; both MXU-friendly
    tm = min(TM_TARGET, _round_up(n, 16))
    np_tm = _round_up(n, tm)
    if np_tm <= TK_TARGET:
        np_, tk = np_tm, np_tm                     # single K step (small graph)
    else:
        np_, tk = _round_up(n, TK_TARGET), TK_TARGET
    grid_rows = np_ // tm
    grid_k = np_ // tk
    vmem_limit = _vmem_limit_bytes()

    # ---- glue: 0/1-count adjacency (bf16, built directly) + f32 1/deg --------
    src, dst = edge_index[0], edge_index[1]
    adj = jnp.zeros((np_, np_), jnp.bfloat16).at[dst, src].add(
        jnp.ones(src.shape, jnp.bfloat16))
    deg = jnp.zeros((np_,), f32).at[dst].add(1.0)
    inv_deg = (1.0 / jnp.maximum(deg, 1.0)).reshape(np_, 1)

    # ---- algebraic folds ------------------------------------------------------
    # feature_transform folded into combine's feature half
    w_xh = params["w_ft"] @ params["w_cmb_f"]                       # [D, H]
    b_h = params["b_cmb"] + params["b_ft"] @ params["w_cmb_f"]      # [1, H]
    # eval-mode BatchNorm -> scale/shift
    scale = params["gamma"] * jax.lax.rsqrt(params["rvar"] + BN_EPS)  # [L,1,H]
    shift = params["beta"] - params["rmean"] * scale

    # Only the LAST SAGEConv's output reaches the residual/head in the
    # reference (h is never reassigned inside its conv loop), so layers
    # 0..L-2 are dead compute; execute only layer L-1 (bit-identical result).
    li = num_layers - 1

    # ---- zero-pad to lane-dense shapes ----------------------------------------
    emb_p = _pad2(emb.astype(f32), np_, ep)
    x_p = _pad2(x.astype(f32), np_, d)
    w_eh_p = _pad2(params["w_cmb_e"], ep, hp)
    w_xh_p = _pad2(w_xh, d, hp)
    b_h_p = _pad2(b_h, 1, hp)
    w_l_p = _pad2(params["w_l"][li], hp, hp)
    w_r_p = _pad2(params["w_r"][li], hp, hp)
    b_l_p = _pad2(params["b_l"][li], 1, hp)
    scale_p = _pad2(scale[li], 1, hp)
    shift_p = _pad2(shift[li], 1, hp)
    w_lin_p = _pad2(params["w_lin"], hp, LANE)     # real logit lives in column 0
    b_lin_p = _pad2(params["b_lin"], 1, LANE)

    # ---- stage 1: h0 = relu(node_emb @ W_e + x @ W_xfused + b), bf16 ---------
    row1 = lambda c: pl.BlockSpec((tm, c), lambda i: (i, 0))
    full1 = lambda a: pl.BlockSpec(a.shape, lambda i: (0, 0))
    h0_bf16 = pl.pallas_call(
        _embed_kernel,
        grid=(grid_rows,),
        in_specs=[row1(ep), row1(d), full1(w_eh_p), full1(w_xh_p), full1(b_h_p)],
        out_specs=row1(hp),
        out_shape=jax.ShapeDtypeStruct((np_, hp), jnp.bfloat16),
        compiler_params=pltpu.CompilerParams(
            dimension_semantics=("parallel",), vmem_limit_bytes=vmem_limit),
    )(emb_p, x_p, w_eh_p, w_xh_p, b_h_p)

    # ---- stage 2+3 fused: aggregation + SAGEConv + BN + ReLU + residual + head
    row2 = lambda c: pl.BlockSpec((tm, c), lambda i, k: (i, 0))
    full2 = lambda a: pl.BlockSpec(a.shape, lambda i, k: (0, 0))
    out_pad = pl.pallas_call(
        _sage_fused_kernel,
        grid=(grid_rows, grid_k),
        in_specs=[
            pl.BlockSpec((tm, tk), lambda i, k: (i, k)),   # A (TM, TK) bf16 slab
            pl.BlockSpec((tk, hp), lambda i, k: (k, 0)),   # h0 K slab (bf16)
            row2(hp),                                      # h0 row tile (lin_r, residual)
            row2(1),                                       # exact f32 1/deg
            full2(w_l_p), full2(b_l_p), full2(w_r_p),
            full2(scale_p), full2(shift_p),
            full2(w_lin_p), full2(b_lin_p),
        ],
        out_specs=pl.BlockSpec((tm, LANE), lambda i, k: (i, 0)),
        out_shape=jax.ShapeDtypeStruct((np_, LANE), f32),
        scratch_shapes=[pltpu.VMEM((tm, hp), f32)],
        compiler_params=pltpu.CompilerParams(
            dimension_semantics=("parallel", "arbitrary"),
            vmem_limit_bytes=vmem_limit),
    )(adj, h0_bf16, h0_bf16, inv_deg,
      w_l_p, b_l_p, w_r_p, scale_p, shift_p, w_lin_p, b_lin_p)

    return out_pad[:n, :1]


# --------------------------------------------------------------------------
# Parameter init (PyTorch-style, eval-mode BN stats) and pure-JAX reference
# --------------------------------------------------------------------------
def _xavier_uniform_raw(key, shape_out_in, gain):
    fan_out, fan_in = shape_out_in
    bound = gain * (6.0 / (fan_in + fan_out)) ** 0.5
    return jax.random.uniform(key, shape_out_in, jnp.float32, -bound, bound)


def _xavier_uniform_t(key, shape_out_in, gain):
    """xavier_uniform_ on a [out, in] weight, returned transposed [in, out]."""
    return _xavier_uniform_raw(key, shape_out_in, gain).T


def init_params(key, *, num_nodes, input_dim, embedding_dim, hidden_dim, num_layers):
    ks = jax.random.split(key, 16)
    p = {}
    # nn.Embedding(num_nodes, embedding_dim), xavier gain 0.1 (arange lookup)
    p["node_emb"] = _xavier_uniform_raw(ks[0], (num_nodes, embedding_dim), 0.1)  # [N, E]
    # feature_transform: Linear(input_dim, embedding_dim)
    p["w_ft"] = _xavier_uniform_t(ks[1], (embedding_dim, input_dim), 0.1)        # [D, E]
    p["b_ft"] = jax.random.uniform(ks[2], (1, embedding_dim), jnp.float32, -0.05, 0.05)
    # combine: Linear(2*embedding_dim, hidden_dim) split into concat halves
    w_cmb = _xavier_uniform_t(ks[3], (hidden_dim, 2 * embedding_dim), 0.1)       # [2E, H]
    p["w_cmb_e"] = w_cmb[:embedding_dim]
    p["w_cmb_f"] = w_cmb[embedding_dim:]
    p["b_cmb"] = jax.random.uniform(ks[4], (1, hidden_dim), jnp.float32, -0.05, 0.05)
    # SAGEConv layers: lin_l (bias), lin_r (no bias)
    p["w_l"] = jnp.stack([_xavier_uniform_t(k, (hidden_dim, hidden_dim), 0.1)
                          for k in jax.random.split(ks[5], num_layers)])         # [L, H, H]
    p["b_l"] = jax.random.uniform(ks[6], (num_layers, 1, hidden_dim), jnp.float32, -0.05, 0.05)
    p["w_r"] = jnp.stack([_xavier_uniform_t(k, (hidden_dim, hidden_dim), 0.1)
                          for k in jax.random.split(ks[7], num_layers)])         # [L, H, H]
    # BatchNorm params / running stats (eval mode)
    p["gamma"] = 1.0 + 0.1 * jax.random.normal(ks[8], (num_layers, 1, hidden_dim), jnp.float32)
    p["beta"] = 0.1 * jax.random.normal(ks[9], (num_layers, 1, hidden_dim), jnp.float32)
    p["rmean"] = 0.1 * jax.random.normal(ks[10], (num_layers, 1, hidden_dim), jnp.float32)
    p["rvar"] = 0.5 + jnp.abs(jax.random.normal(ks[11], (num_layers, 1, hidden_dim), jnp.float32))
    # final lin: Linear(hidden_dim, 1)
    p["w_lin"] = _xavier_uniform_t(ks[12], (1, hidden_dim), 0.1)                 # [H, 1]
    p["b_lin"] = jax.random.uniform(ks[13], (1, 1), jnp.float32, -0.05, 0.05)
    return p


def _reference_forward(x, edge_index, params, num_layers):
    """Pure-JAX f32 reference of the PyTorch forward (eval mode)."""
    n = x.shape[0]
    src, dst = edge_index[0], edge_index[1]
    adj = jnp.zeros((n, n), jnp.float32).at[dst, src].add(1.0)
    deg = jnp.sum(adj, axis=1, keepdims=True)
    a = adj / jnp.maximum(deg, 1.0)
    feat = x @ params["w_ft"] + params["b_ft"]
    h = jnp.maximum(params["node_emb"] @ params["w_cmb_e"]
                    + feat @ params["w_cmb_f"] + params["b_cmb"], 0.0)
    h_new = h
    for i in range(num_layers):   # NOTE: reference feeds the same h every layer
        aggr = a @ h
        z = aggr @ params["w_l"][i] + params["b_l"][i] + h @ params["w_r"][i]
        z = ((z - params["rmean"][i]) * jax.lax.rsqrt(params["rvar"][i] + BN_EPS)
             * params["gamma"][i] + params["beta"][i])
        h_new = jnp.maximum(z, 0.0)
    out = (h_new + h) @ params["w_lin"] + params["b_lin"]
    return jnp.clip(out, -10.0, 10.0)


if __name__ == "__main__":
    NUM_NODES = 64
    INPUT_DIM = 16
    EMBEDDING_DIM = 32
    HIDDEN_DIM = 32
    NUM_LAYERS = 3
    NUM_EDGES = 256

    key = jax.random.PRNGKey(0)
    k_x, k_e, k_p = jax.random.split(key, 3)

    x = jax.random.normal(k_x, (NUM_NODES, INPUT_DIM), jnp.float32)
    edge_index = jax.random.randint(k_e, (2, NUM_EDGES), 0, NUM_NODES, jnp.int32)

    params = init_params(
        k_p,
        num_nodes=NUM_NODES,
        input_dim=INPUT_DIM,
        embedding_dim=EMBEDDING_DIM,
        hidden_dim=HIDDEN_DIM,
        num_layers=NUM_LAYERS,
    )

    out = graphsage_forward(x, edge_index, params, NUM_LAYERS)
    out = jax.block_until_ready(out)

    assert out.shape == (NUM_NODES, 1)
    assert bool(jnp.all(jnp.isfinite(out)))
    assert bool(jnp.all(out <= 10.0)) and bool(jnp.all(out >= -10.0))

    ref = _reference_forward(x, edge_index, params, NUM_LAYERS)
    max_err = float(jnp.max(jnp.abs(out - ref)))
    assert max_err < 5e-2, f"mismatch vs f32 reference: {max_err}"

    print("KERNEL_OK")
</pallas_src>

<mosaic_0001>
module attributes {stable_mosaic.version = 11 : i64} {
  func.func @_embed_kernel(%arg0: i32, %arg1: memref<64x128xf32, #tpu.memory_space<vmem>>, %arg2: memref<64x16xf32, #tpu.memory_space<vmem>>, %arg3: memref<128x128xf32, #tpu.memory_space<vmem>>, %arg4: memref<16x128xf32, #tpu.memory_space<vmem>>, %arg5: memref<1x128xf32, #tpu.memory_space<vmem>>, %arg6: memref<64x128xbf16, #tpu.memory_space<vmem>>) attributes {dimension_semantics = [#tpu.dimension_semantics<parallel>], iteration_bounds = array<i64: 1>, scalar_prefetch = 0 : i64, scratch_operands = 0 : i64, tpu.core_type = #tpu.core_type<tc>, window_params = [{transform_indices = @transform_0, window_bounds = array<i64: 64, 128>}, {transform_indices = @transform_1, window_bounds = array<i64: 64, 16>}, {pipeline_mode = #tpu.pipeline_mode<synchronous>, transform_indices = @transform_2, window_bounds = array<i64: 128, 128>}, {pipeline_mode = #tpu.pipeline_mode<synchronous>, transform_indices = @transform_3, window_bounds = array<i64: 16, 128>}, {pipeline_mode = #tpu.pipeline_mode<synchronous>, transform_indices = @transform_4, window_bounds = array<i64: 1, 128>}, {transform_indices = @transform_5, window_bounds = array<i64: 64, 128>}]} {
    %c0 = arith.constant 0 : index
    %c0_0 = arith.constant 0 : index
    %0 = vector.load %arg1[%c0, %c0_0] : memref<64x128xf32, #tpu.memory_space<vmem>>, vector<64x128xf32>
    %c0_1 = arith.constant 0 : index
    %c0_2 = arith.constant 0 : index
    %1 = vector.load %arg3[%c0_1, %c0_2] : memref<128x128xf32, #tpu.memory_space<vmem>>, vector<128x128xf32>
    %cst = arith.constant dense<0.000000e+00> : vector<64x128xf32>
    %2 = tpu.matmul %0, %1, %cst {dimension_numbers = #tpu.dot_dimension_numbers<[1], [0], [0], [1], [0, 0, 1, 1], [], []>} : vector<64x128xf32>, vector<128x128xf32>, vector<64x128xf32> -> vector<64x128xf32>
    %c0_3 = arith.constant 0 : index
    %c0_4 = arith.constant 0 : index
    %3 = vector.load %arg2[%c0_3, %c0_4] : memref<64x16xf32, #tpu.memory_space<vmem>>, vector<64x16xf32>
    %c0_5 = arith.constant 0 : index
    %c0_6 = arith.constant 0 : index
    %4 = vector.load %arg4[%c0_5, %c0_6] : memref<16x128xf32, #tpu.memory_space<vmem>>, vector<16x128xf32>
    %cst_7 = arith.constant dense<0.000000e+00> : vector<64x128xf32>
    %5 = tpu.matmul %3, %4, %cst_7 {dimension_numbers = #tpu.dot_dimension_numbers<[1], [0], [0], [1], [0, 0, 1, 1], [], []>} : vector<64x16xf32>, vector<16x128xf32>, vector<64x128xf32> -> vector<64x128xf32>
    %6 = arith.addf %2, %5 : vector<64x128xf32>
    %c0_8 = arith.constant 0 : index
    %c0_9 = arith.constant 0 : index
    %7 = vector.load %arg5[%c0_8, %c0_9] : memref<1x128xf32, #tpu.memory_space<vmem>>, vector<1x128xf32>
    %8 = vector.broadcast %7 : vector<1x128xf32> to vector<64x128xf32>
    %9 = arith.addf %6, %8 : vector<64x128xf32>
    %cst_10 = arith.constant 0.000000e+00 : f32
    %10 = vector.broadcast %cst_10 : f32 to vector<64x128xf32>
    %11 = arith.maximumf %9, %10 : vector<64x128xf32>
    %12 = arith.truncf %11 : vector<64x128xf32> to vector<64x128xbf16>
    %c0_11 = arith.constant 0 : index
    %c0_12 = arith.constant 0 : index
    %13 = vector.load %arg6[%c0_11, %c0_12] : memref<64x128xbf16, #tpu.memory_space<vmem>>, vector<64x128xbf16>
    tpu.vector_store %arg6[%c0_11, %c0_12], %12 {strides = array<i32>} : memref<64x128xbf16, #tpu.memory_space<vmem>>, vector<64x128xbf16>,
    return
  }
  func.func @transform_0(%arg0: i32) -> (i32, i32) {
    %c0_i32 = arith.constant 0 : i32
    %c0_i32_0 = arith.constant 0 : i32
    return %arg0, %c0_i32 : i32, i32
  }
  func.func @transform_1(%arg0: i32) -> (i32, i32) {
    %c0_i32 = arith.constant 0 : i32
    %c0_i32_0 = arith.constant 0 : i32
    return %arg0, %c0_i32 : i32, i32
  }
  func.func @transform_2(%arg0: i32) -> (i32, i32) {
    %c0_i32 = arith.constant 0 : i32
    %c0_i32_0 = arith.constant 0 : i32
    %c0_i32_1 = arith.constant 0 : i32
    return %c0_i32, %c0_i32_0 : i32, i32
  }
  func.func @transform_3(%arg0: i32) -> (i32, i32) {
    %c0_i32 = arith.constant 0 : i32
    %c0_i32_0 = arith.constant 0 : i32
    %c0_i32_1 = arith.constant 0 : i32
    return %c0_i32, %c0_i32_0 : i32, i32
  }
  func.func @transform_4(%arg0: i32) -> (i32, i32) {
    %c0_i32 = arith.constant 0 : i32
    %c0_i32_0 = arith.constant 0 : i32
    %c0_i32_1 = arith.constant 0 : i32
    return %c0_i32, %c0_i32_0 : i32, i32
  }
  func.func @transform_5(%arg0: i32) -> (i32, i32) {
    %c0_i32 = arith.constant 0 : i32
    %c0_i32_0 = arith.constant 0 : i32
    return %arg0, %c0_i32 : i32, i32
  }
}

</mosaic_0001>

<bundles_post_ra>
// kernel: tpu_custom_call.1
= control target key start
LH: loop header
LB: loop body
LE: loop exit
PB: predicated region body
PF: predicated region fallthrough
CT: control target
= control target key end

     0   :  { %10 = vsyncpa [#allocation3], 0  ;;  %s765_s0 = inlined_call_operand.vmem [shape: f32[64,128], index: 0, kind: input, shape index: {}]   ;;  %s766_s1 = inlined_call_operand.vmem [shape: f32[64,16], index: 1, kind: input, shape index: {}]   ;;  %s767_s2 = inlined_call_operand.hbm [shape: f32[128,128], index: 2, kind: input, shape index: {}]   ;;  %s768_s3 = inlined_call_operand.vmem [shape: f32[16,128], index: 3, kind: input, shape index: {}]   ;;  %s769_s4 = inlined_call_operand.vmem [shape: f32[1,128], index: 4, kind: input, shape index: {}]   ;;  %s770_s5 = inlined_call_operand.hbm [shape: bf16[64,128], index: 5, kind: output, shape index: {}]  }
   0x1   :  { %11 = vsyncpa [#allocation4], 0  ;;  %s640_s18 = smov [#allocation2]   ;;  %s592_s22 = scalar_lea.hbm %s767_s2, 2048 }
   0x2   :  { %s21_s19 = sshll.u32 %s640_s18, 4  ;;  %p593_p0 = scmp.ne.s32.totalorder %s767_s2, %s592_s22  ;;  %s22_s19 = int_to_ptr.vmem [resolvable:$true] %s21_s19 }
   0x3   :  { %p596_p1 = scmp.lt.u32.totalorder %s592_s22, %s767_s2 }
   0x5   :  { %p598_p2 = pnand %p596_p1, %p593_p0 }
   0x7   :  { %601 = shalt.err (!%p598_p2)
}
   0x8   :  { %s602_s27 = scalar_lea.vmem %s22_s19, 2048  ;;  %p607_p4 = scmp.lt.s32.totalorder %s22_s19, %s22_s19 }
   0x9   :  { %p603_p3 = scmp.ne.s32.totalorder %s22_s19, %s602_s27  ;;  %p608_p5 = scmp.lt.s32.totalorder %s602_s27, %s602_s27 }
   0xb   :  { %p609_p6 = por %p608_p5, %p607_p4 }
   0xd   :  { %p610_p7 = pnand %p609_p6, %p603_p3 }
   0xf   :  { %613 = shalt.err (!%p610_p7)
}
  0x10   :  { %s641_s28 = smov 128   ;;  %s642_s29 = smov 8  }
  0x11   :  { %27 = dma.hbm_to_vmem [thread:$0]  %s767_s2, 2048, %s22_s19, [#allocation3], %s641_s28, %s641_s28, %s642_s29  }
  0x12   :  { %636 = dma.done.wait [#allocation3], 2048  }
  0x13   :  { %637 = vsyncadd [#allocation3], 4294965248  ;;  %vm69_vm0 = vcmask 130048   ;;  %v67_v0 = vld [vmem:[%s768_s3] sm:$0xff]  ;;  %v68_v1 = vld [vmem:[%s768_s3 + $0x8] sm:$0xff] }
  0x14   :  { %v43_v2 = vld [vmem:[#allocation2] sm:$0xff]  ;;  %v526_v3 = vpack.c.bf16 %v68_v1, %v67_v0  ;;  %v44_v4 = vld [vmem:[#allocation2 + $0x8] sm:$0xff]  ;;  %v45_v6 = vld [vmem:[#allocation2 + $0x10] sm:$0xff] }
  0x15   :  { %v59_v5 = vld [vmem:[%s766_s1] sm:$0xff]  ;;  %v530_v7 = vpack.c.bf16 %v44_v4, %v43_v2  ;;  %v46_v8 = vld [vmem:[#allocation2 + $0x18] sm:$0xff]  ;;  %v48_v11 = vld [vmem:[#allocation2 + $0x28] sm:$0xff] }
  0x16   :  { %470 = vmatprep.mubr.msk.f32.mxu0 %vm69_vm0, %v59_v5  ;;  %527 = vmatprep.subr.bf16.mxu0 %v526_v3  ;;  %v534_v9 = vpack.c.bf16 %v46_v8, %v45_v6  ;;  %v47_v10 = vld [vmem:[#allocation2 + $0x20] sm:$0xff]  ;;  %v60_v12 = vld [vmem:[%s766_s1 + $0x8] sm:$0xff]  ;;  %v61_v13 = vld [vmem:[%s766_s1 + $0x10] sm:$0xff] }
  0x17   :  { %562 = vmatprep.subr.bf16.mxu1 %v530_v7  ;;  %529 = vmatpush3.bf16.msra.mxu0 %v526_v3  ;;  %v538_v14 = vpack.c.bf16 %v48_v11, %v47_v10  ;;  %v49_v15 = vld [vmem:[#allocation2 + $0x30] sm:$0xff]  ;;  %v50_v16 = vld [vmem:[#allocation2 + $0x38] sm:$0xff]  ;;  %v63_v19 = vld [vmem:[%s766_s1 + $0x20] sm:$0xff] }
  0x18   :  { %570 = vmatpush3.bf16.msra.mxu1 %v530_v7  ;;  %531 = vmatprep.subr.bf16.mxu0 %v530_v7  ;;  %v62_v17 = vld [vmem:[%s766_s1 + $0x18] sm:$0xff]  ;;  %v37_v18 = vld [vmem:[%s765_s0 + $0x10] sm:$0xff]  ;;  %v542_v20 = vpack.c.bf16 %v50_v16, %v49_v15  ;;  %v51_v21 = vld [vmem:[#allocation2 + $0x40] sm:$0xff] }
  0x19   :  { %563 = vmatprep.subr.bf16.mxu1 %v534_v9  ;;  %517 = vmatprep.mubr.f32.mxu1 %v37_v18  ;;  %v52_v22 = vld [vmem:[#allocation2 + $0x48] sm:$0xff]  ;;  %v65_v24 = vld [vmem:[%s766_s1 + $0x30] sm:$0xff]  ;;  %v54_v27 = vld [vmem:[#allocation2 + $0x58] sm:$0xff] }
  0x1a   :  { %471 = vmatmul.mubr.msk.f32.vlgmr.msra.gmra.mrb[0].mxu0 %vm69_vm0, %v60_v12  ;;  %v64_v23 = vld [vmem:[%s766_s1 + $0x28] sm:$0xff]  ;;  %v546_v25 = vpack.c.bf16 %v52_v22, %v51_v21  ;;  %v53_v26 = vld [vmem:[#allocation2 + $0x50] sm:$0xff]  ;;  %v66_v28 = vld [vmem:[%s766_s1 + $0x38] sm:$0xff] }
  0x1b   :  { %533 = vmatpush3.bf16.msra.mxu0 %v530_v7  ;;  %473 = vmatprep.mubr.msk.f32.mxu0 %vm69_vm0, %v61_v13  ;;  %v35_v29 = vld [vmem:[%s765_s0] sm:$0xff]  ;;  %v550_v30 = vpack.c.bf16 %v54_v27, %v53_v26  ;;  %v56_v32 = vld [vmem:[#allocation2 + $0x68] sm:$0xff]  ;;  %v57_v34 = vld [vmem:[#allocation2 + $0x70] sm:$0xff] }
  0x1c   :  { %571 = vmatpush3.bf16.msra.mxu1 %v534_v9  ;;  %535 = vmatprep.subr.bf16.mxu0 %v534_v9  ;;  %v55_v31 = vld [vmem:[#allocation2 + $0x60] sm:$0xff]  ;;  %v58_v35 = vld [vmem:[#allocation2 + $0x78] sm:$0xff]  ;;  %v36_v39 = vld [vmem:[%s765_s0 + $0x8] sm:$0xff] }
  0x1d   :  { %564 = vmatprep.subr.bf16.mxu1 %v538_v14  ;;  %v554_v33 = vpack.c.bf16 %v56_v32, %v55_v31  ;;  %v558_v36 = vpack.c.bf16 %v58_v35, %v57_v34  ;;  %v38_v37 = vld [vmem:[%s765_s0 + $0x18] sm:$0xff]  ;;  %v39_v38 = vld [vmem:[%s765_s0 + $0x20] sm:$0xff]  ;;  %v40_v40 = vld [vmem:[%s765_s0 + $0x28] sm:$0xff] }
  0x1e   :  { %474 = vmatmul.mubr.msk.f32.gmra.mrb[2].mxu0 %vm69_vm0, %v62_v17  ;;  %v41_v41 = vld [vmem:[%s765_s0 + $0x30] sm:$0xff]  ;;  %v42_v42 = vld [vmem:[%s765_s0 + $0x38] sm:$0xff]  ;;  %v392_v50 = vld [vmem:[%s769_s4] ss:$0 sm:$0xff]  ;;  %s643_s0 = smov [#allocation5]  }
  0x1f   :  { %537 = vmatpush3.bf16.msra.mxu0 %v534_v9  ;;  %476 = vmatprep.mubr.msk.f32.mxu0 %vm69_vm0, %v63_v19  ;;  %s372_s4 = sshll.u32 %s643_s0, 4  ;;  %s373_s4 = int_to_ptr.vmem [resolvable:$true] %s372_s4 }
  0x20   :  { %572 = vmatpush3.bf16.msra.mxu1 %v538_v14  ;;  %539 = vmatprep.subr.bf16.mxu0 %v538_v14  ;;  %s614_s15 = scalar_lea.vmem %s373_s4, 512  ;;  %p619_p9 = scmp.lt.s32.totalorder %s373_s4, %s373_s4 }
  0x21   :  { %565 = vmatprep.subr.bf16.mxu1 %v542_v20  ;;  %p615_p8 = scmp.ne.s32.totalorder %s373_s4, %s614_s15  ;;  %p620_p10 = scmp.lt.s32.totalorder %s614_s15, %s614_s15 }
  0x22   :  { %477 = vmatmul.mubr.msk.f32.gmra.mrb[4].mxu0 %vm69_vm0, %v64_v23 }
  0x23   :  { %541 = vmatpush3.bf16.msra.mxu0 %v538_v14  ;;  %479 = vmatprep.mubr.msk.f32.mxu0 %vm69_vm0, %v65_v24  ;;  %p621_p11 = por %p620_p10, %p619_p9 }
  0x24   :  { %573 = vmatpush3.bf16.msra.mxu1 %v542_v20  ;;  %543 = vmatprep.subr.bf16.mxu0 %v542_v20 }
  0x25   :  { %566 = vmatprep.subr.bf16.mxu1 %v546_v25  ;;  %p622_p12 = pnand %p621_p11, %p615_p8 }
  0x26   :  { %480 = vmatmul.mubr.msk.f32.gmra.mrb[6].mxu0 %vm69_vm0, %v66_v28 }
  0x27   :  { %545 = vmatpush3.bf16.msra.mxu0 %v542_v20  ;;  %514 = vmatprep.mubr.f32.mxu0 %v35_v29 }
  0x28   :  { %574 = vmatpush3.bf16.msra.mxu1 %v546_v25  ;;  %547 = vmatprep.subr.bf16.mxu0 %v546_v25 }
  0x29   :  { %567 = vmatprep.subr.bf16.mxu1 %v550_v30 }
  0x2b   :  { %549 = vmatpush3.bf16.msra.mxu0 %v546_v25 }
  0x2c   :  { %575 = vmatpush3.bf16.msra.mxu1 %v550_v30  ;;  %551 = vmatprep.subr.bf16.mxu0 %v550_v30 }
  0x2d   :  { %568 = vmatprep.subr.bf16.mxu1 %v554_v33 }
  0x2f   :  { %553 = vmatpush3.bf16.msra.mxu0 %v550_v30 }
  0x30   :  { %576 = vmatpush3.bf16.msra.mxu1 %v554_v33  ;;  %555 = vmatprep.subr.bf16.mxu0 %v554_v33 }
  0x31   :  { %569 = vmatprep.subr.bf16.mxu1 %v558_v36 }
  0x33   :  { %557 = vmatpush3.bf16.msra.mxu0 %v554_v33 }
  0x34   :  { %577 = vmatpush3.bf16.msra.mxu1 %v558_v36  ;;  %559 = vmatprep.subr.bf16.mxu0 %v558_v36 }
  0x37   :  { %518 = vmatmul.mubr.f32.vlgmr.msra.gmra.mrb[0].mxu1 %v38_v37  ;;  %561 = vmatpush3.bf16.msra.mxu0 %v558_v36 }
  0x38   :  { %520 = vmatprep.mubr.f32.mxu1 %v39_v38 }
  0x3a   :  { %515 = vmatmul.mubr.f32.vlgmr.msra.gmra.mrb[0].mxu0 %v36_v39 }
  0x3b   :  { %521 = vmatmul.mubr.f32.gmra.mrb[2].mxu1 %v40_v40 }
  0x3c   :  { %523 = vmatprep.mubr.f32.mxu1 %v41_v41 }
  0x3f   :  { %524 = vmatmul.mubr.f32.gmra.mrb[4].mxu1 %v42_v42 }
  0xf1   :  { %v475_v43 = vpop.f32.mrb[2].mxu0 }
  0xf2   :  { %v170_v44 = vpop.f32.mrb[3].mxu0 }
  0xf5   :  { %v478_v45 = vpop.f32.mrb[4].mxu0 }
  0xf6   :  { %v180_v46 = vpop.f32.mrb[5].mxu0 }
  0xf9   :  { %v481_v47 = vpop.f32.mrb[6].mxu0 }
  0xfa   :  { %v190_v48 = vpop.f32.mrb[7].mxu0 }
 0x10a   :  { %v519_v49 = vpop.f32.mrb[0].mxu1 }
 0x10b   :  { %v281_v51 = vadd.f32 %v519_v49, %v475_v43  ;;  %v275_v52 = vpop.f32.mrb[1].mxu1 }
 0x10c   :  { %v276_v53 = vadd.f32 %v275_v52, %v170_v44 }
 0x10d   :  { %v314_v54 = vadd.f32 %v392_v50, %v281_v51  ;;  %v516_v55 = vpop.f32.mrb[0].mxu0 }
 0x10e   :  { %v313_v56 = vadd.f32 %v392_v50, %v276_v53  ;;  %v312_v57 = vadd.f32 %v516_v55, %v392_v50  ;;  %v522_v58 = vpop.f32.mrb[2].mxu1  ;;  %v265_v59 = vpop.f32.mrb[1].mxu0 }
 0x10f   :  { %v322_v60 = vmax.f32 %v314_v54, 0.0  ;;  %v291_v61 = vadd.f32 %v522_v58, %v478_v45  ;;  %v311_v62 = vadd.f32 %v392_v50, %v265_v59  ;;  %v285_v63 = vpop.f32.mrb[3].mxu1 }
 0x110   :  { %v321_v0 = vmax.f32 %v313_v56, 0.0  ;;  %v320_v1 = vmax.f32 %v312_v57, 0.0  ;;  %v286_v2 = vadd.f32 %v285_v63, %v180_v46 }
 0x111   :  { %v316_v3 = vadd.f32 %v392_v50, %v291_v61  ;;  %v319_v4 = vmax.f32 %v311_v62, 0.0 }
 0x112   :  { %v417_v5 = vpack.c.bf16 %v322_v60, %v321_v0  ;;  %v315_v6 = vadd.f32 %v392_v50, %v286_v2  ;;  %v525_v7 = vpop.f32.mrb[4].mxu1 }
 0x113   :  { %v324_v8 = vmax.f32 %v316_v3, 0.0  ;;  %v412_v9 = vpack.c.bf16 %v320_v1, %v319_v4  ;;  %v301_v10 = vadd.f32 %v525_v7, %v481_v47  ;;  %v295_v11 = vpop.f32.mrb[5].mxu1 }
 0x114   :  { %429 = vst [vmem:[#allocation5 + $0x8] sm:$0xff] %v417_v5   ;;  %v323_v12 = vmax.f32 %v315_v6, 0.0  ;;  %v296_v13 = vadd.f32 %v295_v11, %v190_v48 }
 0x115   :  { %413 = vst [vmem:[#allocation5] sm:$0xff] %v412_v9   ;;  %v318_v14 = vadd.f32 %v392_v50, %v301_v10 }
 0x116   :  { %v422_v15 = vpack.c.bf16 %v324_v8, %v323_v12  ;;  %v317_v16 = vadd.f32 %v392_v50, %v296_v13 }
 0x117   :  { %v326_v17 = vmax.f32 %v318_v14, 0.0 }
 0x118   :  { %430 = vst [vmem:[#allocation5 + $0x10] sm:$0xff] %v422_v15   ;;  %v325_v18 = vmax.f32 %v317_v16, 0.0 }
 0x11a   :  { %v427_v19 = vpack.c.bf16 %v326_v17, %v325_v18 }
 0x11c   :  { %431 = vst [vmem:[#allocation5 + $0x18] sm:$0xff] %v427_v19  }
 0x11d   :  { %625 = shalt.err (!%p622_p12)
}
 0x11e   :  { %s626_s18 = scalar_lea.hbm %s770_s5, 512 }
 0x11f   :  { %p627_p13 = scmp.ne.s32.totalorder %s770_s5, %s626_s18  ;;  %p630_p0 = scmp.lt.u32.totalorder %s626_s18, %s770_s5 }
 0x121   :  { %p632_p1 = pnand %p630_p0, %p627_p13 }
 0x123   :  { %635 = shalt.err (!%p632_p1)
}
 0x124   :  { %s644_s23 = smov 64   ;;  %s645_s24 = smov 4  }
 0x125   :  { %378 = dma.vmem_to_hbm [thread:$0]  %s373_s4, 512, %s770_s5, [#allocation4], %s644_s23, %s644_s23, %s645_s24  }
 0x126   :  { %638 = dma.done.wait [#allocation4], 512  }
 0x127   :  { %639 = vsyncadd [#allocation4], 4294966784 }
 0x128   :  { %382 = vsyncpa [#allocation3], 1 }
 0x129   :  { %383 = vsyncpa [#allocation4], 1 }

</bundles_post_ra>
